<compile_context>
chip_gen: v7x
topology: tpu7x:2x2x1
jax: 0.10.0
libtpu: 0.0.40
codegen_flags: <defaults>
</compile_context>

<pallas_src>
import jax
import jax.numpy as jnp
from jax.experimental import pallas as pl
from jax.experimental.pallas import tpu as pltpu


# ----------------------------------------------------------------------------
# Kernel
# ----------------------------------------------------------------------------
def _mean_pool_kernel(h_ref, m_ref, o_ref, cnt_ref):
    # h_ref:   (bB, tS, H)  hidden-state tile (input dtype)
    # m_ref:   (bB, tS, 1)  attention-mask tile, already cast to the input dtype
    # o_ref:   (bB, H) f32  resident output block; used as the accumulator
    # cnt_ref: (bB, 1) f32  running token counts
    s = pl.program_id(1)

    @pl.when(s == 0)
    def _init():
        o_ref[...] = jnp.zeros_like(o_ref)
        cnt_ref[...] = jnp.zeros_like(cnt_ref)

    h = h_ref[...]                                    # (bB, tS, H)
    w = m_ref[...]                                    # (bB, tS, 1), 0/1 values

    # Multiply in the input dtype (exact for a 0/1 mask), accumulate in f32.
    masked = (h * w).astype(jnp.float32)              # (bB, tS, H)
    o_ref[...] += jnp.sum(masked, axis=1)             # (bB, H)
    cnt_ref[...] += jnp.sum(w.astype(jnp.float32), axis=1)   # (bB, 1)

    @pl.when(s == pl.num_programs(1) - 1)
    def _finalize():
        denom = jnp.maximum(cnt_ref[...], 1e-9)       # torch.clamp(min=1e-9)
        o_ref[...] = o_ref[...] / denom


# ----------------------------------------------------------------------------
# Block / VMEM sizing helpers
# ----------------------------------------------------------------------------
def _vmem_capacity_bytes():
    """Per-core VMEM capacity; conservative (v7x) default if the query fails."""
    try:
        info = pltpu.get_tpu_info()
        cap = int(getattr(info, "vmem_capacity_bytes", 0))
        if cap > 0:
            return cap
    except Exception:
        pass
    return 64 << 20   # v7x has 64 MiB per TensorCore; v5e/v6e have 128 MiB.


def _mult8_divisors(n):
    return [d for d in range(8, n + 1, 8) if n % d == 0]


def _mask_tile_bytes(bb, ts, itemsize):
    # The (bb, ts, 1) tile pads its last dim to 128 lanes in VMEM.
    return bb * ts * 128 * itemsize


def _step_in_bytes(bb, ts, H, itemsize):
    return bb * ts * H * itemsize + _mask_tile_bytes(bb, ts, itemsize)


def _resident_bytes(bb, H):
    # Resident f32 output block (count it twice for safety) + tiny count tile.
    return bb * H * 4 * 2 + 64 * 1024


def _pick_blocks(B, S, H, itemsize, vmem_capacity):
    """Pick (bB, tS) so that:
      - per-step input tiles are ~16 MiB (amortizes the ~0.35 us/step overhead),
      - 2x double-buffered inputs + resident output fit ~70% of VMEM capacity,
      - tiling rules hold (each block dim is a multiple of 8 or the full dim),
      - the batch grid axis has >= 2 steps when B >= 16 (v7x megacore).
    tS is grown first; bB only once tS already covers the whole sequence.
    """
    usable = min(int(vmem_capacity * 0.7), 96 << 20)
    step_target = 16 << 20
    margin = 2 << 20

    b_divs = _mult8_divisors(B)
    if b_divs:
        b_cands = [d for d in b_divs if B >= 16 and d <= B // 2] or [b_divs[0]]
    else:
        # TODO(synk): B with no multiple-of-8 divisor forces a single batch block;
        # handle huge such B via cdiv + remainder masking if it ever matters.
        b_cands = [B]

    s_cands = sorted(set(_mult8_divisors(S) + [S]))

    bb = b_cands[0]
    cap = min(step_target, max((usable - _resident_bytes(bb, H) - margin) // 2, 0))
    fits = [ts for ts in s_cands if _step_in_bytes(bb, ts, H, itemsize) <= cap]
    ts = max(fits) if fits else s_cands[0]

    if ts == S:
        # Whole sequence already per step: spend leftover budget on a larger bB
        # (fewer, larger grid steps) while staying within the per-step target.
        for cand in b_cands[1:]:
            c_cap = min(step_target,
                        max((usable - _resident_bytes(cand, H) - margin) // 2, 0))
            if _step_in_bytes(cand, S, H, itemsize) <= c_cap:
                bb = cand
            else:
                break
    return bb, ts


# ----------------------------------------------------------------------------
# Wrapper
# ----------------------------------------------------------------------------
def mean_pooling(last_hidden_state, attention_mask, *, batch_block=None, seq_block=None):
    """Masked mean pooling over the sequence axis.

    last_hidden_state: [B, S, H] float (f32 / bf16)
    attention_mask:    [B, S]    any numeric dtype (0/1)
    returns:           [B, H]    float32
    """
    B, S, H = last_hidden_state.shape
    itemsize = last_hidden_state.dtype.itemsize
    vmem_capacity = _vmem_capacity_bytes()

    auto_bB, auto_tS = _pick_blocks(B, S, H, itemsize, vmem_capacity)
    bB = batch_block if batch_block is not None else auto_bB
    tS = seq_block if seq_block is not None else auto_tS

    if B % bB != 0 or not (bB % 8 == 0 or bB == B):
        raise ValueError(
            f"batch_block={bB} must divide B={B} and be a multiple of 8 (or equal to B)")
    if S % tS != 0 or not (tS % 8 == 0 or tS == S):
        raise ValueError(
            f"seq_block={tS} must divide S={S} and be a multiple of 8 (or equal to S)")

    # Cast the mask to the hidden dtype in the wrapper (exact for 0/1 masks).
    mask3d = attention_mask.astype(last_hidden_state.dtype).reshape(B, S, 1)

    # Explicit scoped-VMEM limit sized to the actual working set (double-
    # buffered inputs + resident output), capped below physical capacity.
    working = 2 * _step_in_bytes(bB, tS, H, itemsize) + _resident_bytes(bB, H) + (4 << 20)
    vmem_limit = int(min(max(working, 32 << 20), int(vmem_capacity * 0.9)))

    out = pl.pallas_call(
        _mean_pool_kernel,
        out_shape=jax.ShapeDtypeStruct((B, H), jnp.float32),
        grid_spec=pltpu.PrefetchScalarGridSpec(
            num_scalar_prefetch=0,
            grid=(B // bB, S // tS),
            in_specs=[
                pl.BlockSpec((bB, tS, H), lambda b, s: (b, s, 0)),
                pl.BlockSpec((bB, tS, 1), lambda b, s: (b, s, 0)),
            ],
            # Same output block index across the s axis -> stays VMEM-resident
            # for the whole sequence reduction; serves as the accumulator.
            out_specs=pl.BlockSpec((bB, H), lambda b, s: (b, 0)),
            scratch_shapes=[
                pltpu.VMEM((bB, 1), jnp.float32),   # running token counts
            ],
        ),
        compiler_params=pltpu.CompilerParams(
            dimension_semantics=("parallel", "arbitrary"),
            vmem_limit_bytes=vmem_limit,
        ),
    )(last_hidden_state, mask3d)

    return out


# ----------------------------------------------------------------------------
# Reference + self-test
# ----------------------------------------------------------------------------
def _reference(last_hidden_state, attention_mask):
    m = attention_mask[..., None].astype(jnp.float32)
    sum_emb = jnp.sum(last_hidden_state.astype(jnp.float32) * m, axis=1)
    sum_mask = jnp.maximum(jnp.sum(m, axis=1), 1e-9)
    return sum_emb / sum_mask


if __name__ == "__main__":
    key = jax.random.PRNGKey(0)
    k1, k2, k3, k4, k5, k6 = jax.random.split(key, 6)

    # 1) Small shape matching the module layout: [B, S, H] + [B, S] mask.
    B, S, H = 2, 8, 32
    h1 = jax.random.normal(k1, (B, S, H), dtype=jnp.float32)
    m1 = (jax.random.uniform(k2, (B, S)) > 0.3).astype(jnp.int32)
    out1 = mean_pooling(h1, m1)
    jax.block_until_ready(out1)
    ref1 = _reference(h1, m1)
    assert out1.shape == (B, H)
    assert jnp.allclose(out1, ref1, atol=1e-5, rtol=1e-5)

    # 2) Explicitly exercise the sequence-tiled resident-output accumulator
    #    (grid = (1, 4): init / accumulate / finalize via pl.when).
    B2, S2, H2 = 4, 256, 128
    h2 = jax.random.normal(k3, (B2, S2, H2), dtype=jnp.float32)
    m2 = (jax.random.uniform(k4, (B2, S2)) > 0.5).astype(jnp.int32)
    out2 = mean_pooling(h2, m2, batch_block=B2, seq_block=64)
    jax.block_until_ready(out2)
    ref2 = _reference(h2, m2)
    assert out2.shape == (B2, H2)
    assert jnp.allclose(out2, ref2, atol=1e-4, rtol=1e-4)

    # 3) Auto-picked blocks, bf16 inputs, >= 2 batch grid steps (B=16 -> bB=8).
    B3, S3, H3 = 16, 128, 64
    h3 = jax.random.normal(k5, (B3, S3, H3), dtype=jnp.bfloat16)
    m3 = (jax.random.uniform(k6, (B3, S3)) > 0.5).astype(jnp.int32)
    out3 = mean_pooling(h3, m3)
    jax.block_until_ready(out3)
    ref3 = _reference(h3, m3)
    assert out3.shape == (B3, H3)
    assert jnp.allclose(out3, ref3, atol=2e-3, rtol=2e-3)

    print("KERNEL_OK")
</pallas_src>

<mosaic_0001>
module attributes {stable_mosaic.version = 11 : i64} {
  func.func @_mean_pool_kernel(%arg0: i32, %arg1: i32, %arg2: memref<2x8x32xf32, #tpu.memory_space<vmem>>, %arg3: memref<2x8x1xf32, #tpu.memory_space<vmem>>, %arg4: memref<2x32xf32, #tpu.memory_space<vmem>>, %arg5: memref<2x1xf32, #tpu.memory_space<vmem>>) attributes {dimension_semantics = [#tpu.dimension_semantics<parallel>, #tpu.dimension_semantics<arbitrary>], iteration_bounds = array<i64: 1, 1>, scalar_prefetch = 0 : i64, scratch_operands = 1 : i64, tpu.core_type = #tpu.core_type<tc>, window_params = [{transform_indices = @transform_0, window_bounds = array<i64: 2, 8, 32>}, {transform_indices = @transform_1, window_bounds = array<i64: 2, 8, 1>}, {transform_indices = @transform_2, window_bounds = array<i64: 2, 32>}]} {
    %c0_i32 = arith.constant 0 : i32
    %0 = arith.cmpi eq, %arg1, %c0_i32 : i32
    %1 = arith.extui %0 : i1 to i32
    %c0_i32_0 = arith.constant 0 : i32
    %2 = arith.cmpi ne, %1, %c0_i32_0 : i32
    scf.if %2 {
      %cst_17 = arith.constant 0.000000e+00 : f32
      %18 = vector.broadcast %cst_17 : f32 to vector<2x32xf32>
      %c0_18 = arith.constant 0 : index
      %c0_19 = arith.constant 0 : index
      %19 = vector.load %arg4[%c0_18, %c0_19] : memref<2x32xf32, #tpu.memory_space<vmem>>, vector<2x32xf32>
      tpu.vector_store %arg4[%c0_18, %c0_19], %18 {strides = array<i32>} : memref<2x32xf32, #tpu.memory_space<vmem>>, vector<2x32xf32>,
      %cst_20 = arith.constant 0.000000e+00 : f32
      %20 = vector.broadcast %cst_20 : f32 to vector<2x1xf32>
      %c0_21 = arith.constant 0 : index
      %c0_22 = arith.constant 0 : index
      %21 = vector.load %arg5[%c0_21, %c0_22] : memref<2x1xf32, #tpu.memory_space<vmem>>, vector<2x1xf32>
      tpu.vector_store %arg5[%c0_21, %c0_22], %20 {strides = array<i32>} : memref<2x1xf32, #tpu.memory_space<vmem>>, vector<2x1xf32>,
    } else {
    }
    %c0 = arith.constant 0 : index
    %c0_1 = arith.constant 0 : index
    %c0_2 = arith.constant 0 : index
    %3 = vector.load %arg2[%c0, %c0_1, %c0_2] : memref<2x8x32xf32, #tpu.memory_space<vmem>>, vector<2x8x32xf32>
    %c0_3 = arith.constant 0 : index
    %c0_4 = arith.constant 0 : index
    %c0_5 = arith.constant 0 : index
    %4 = vector.load %arg3[%c0_3, %c0_4, %c0_5] : memref<2x8x1xf32, #tpu.memory_space<vmem>>, vector<2x8x1xf32>
    %5 = vector.broadcast %4 : vector<2x8x1xf32> to vector<2x8x32xf32>
    %6 = arith.mulf %3, %5 : vector<2x8x32xf32>
    %c0_6 = arith.constant 0 : index
    %c0_7 = arith.constant 0 : index
    %7 = vector.load %arg4[%c0_6, %c0_7] : memref<2x32xf32, #tpu.memory_space<vmem>>, vector<2x32xf32>
    %cst = arith.constant dense<0.000000e+00> : vector<2x32xf32>
    %8 = vector.multi_reduction <add>, %6, %cst [1] : vector<2x8x32xf32> to vector<2x32xf32>
    %9 = arith.addf %7, %8 : vector<2x32xf32>
    %c0_8 = arith.constant 0 : index
    %c0_9 = arith.constant 0 : index
    %10 = vector.load %arg4[%c0_8, %c0_9] : memref<2x32xf32, #tpu.memory_space<vmem>>, vector<2x32xf32>
    tpu.vector_store %arg4[%c0_8, %c0_9], %9 {strides = array<i32>} : memref<2x32xf32, #tpu.memory_space<vmem>>, vector<2x32xf32>,
    %c0_10 = arith.constant 0 : index
    %c0_11 = arith.constant 0 : index
    %11 = vector.load %arg5[%c0_10, %c0_11] : memref<2x1xf32, #tpu.memory_space<vmem>>, vector<2x1xf32>
    %cst_12 = arith.constant dense<0.000000e+00> : vector<2x1xf32>
    %12 = vector.multi_reduction <add>, %4, %cst_12 [1] : vector<2x8x1xf32> to vector<2x1xf32>
    %13 = arith.addf %11, %12 : vector<2x1xf32>
    %c0_13 = arith.constant 0 : index
    %c0_14 = arith.constant 0 : index
    %14 = vector.load %arg5[%c0_13, %c0_14] : memref<2x1xf32, #tpu.memory_space<vmem>>, vector<2x1xf32>
    tpu.vector_store %arg5[%c0_13, %c0_14], %13 {strides = array<i32>} : memref<2x1xf32, #tpu.memory_space<vmem>>, vector<2x1xf32>,
    %c0_i32_15 = arith.constant 0 : i32
    %15 = arith.cmpi eq, %arg1, %c0_i32_15 : i32
    %16 = arith.extui %15 : i1 to i32
    %c0_i32_16 = arith.constant 0 : i32
    %17 = arith.cmpi ne, %16, %c0_i32_16 : i32
    scf.if %17 {
      %c0_17 = arith.constant 0 : index
      %c0_18 = arith.constant 0 : index
      %18 = vector.load %arg5[%c0_17, %c0_18] : memref<2x1xf32, #tpu.memory_space<vmem>>, vector<2x1xf32>
      %cst_19 = arith.constant 9.99999971E-10 : f32
      %19 = vector.broadcast %cst_19 : f32 to vector<2x1xf32>
      %20 = arith.maximumf %18, %19 : vector<2x1xf32>
      %c0_20 = arith.constant 0 : index
      %c0_21 = arith.constant 0 : index
      %21 = vector.load %arg4[%c0_20, %c0_21] : memref<2x32xf32, #tpu.memory_space<vmem>>, vector<2x32xf32>
      %22 = vector.broadcast %20 : vector<2x1xf32> to vector<2x32xf32>
      %23 = arith.divf %21, %22 : vector<2x32xf32>
      %c0_22 = arith.constant 0 : index
      %c0_23 = arith.constant 0 : index
      %24 = vector.load %arg4[%c0_22, %c0_23] : memref<2x32xf32, #tpu.memory_space<vmem>>, vector<2x32xf32>
      tpu.vector_store %arg4[%c0_22, %c0_23], %23 {strides = array<i32>} : memref<2x32xf32, #tpu.memory_space<vmem>>, vector<2x32xf32>,
    } else {
    }
    return
  }
  func.func @transform_0(%arg0: i32, %arg1: i32) -> (i32, i32, i32) {
    %c0_i32 = arith.constant 0 : i32
    %c0_i32_0 = arith.constant 0 : i32
    return %arg0, %arg1, %c0_i32 : i32, i32, i32
  }
  func.func @transform_1(%arg0: i32, %arg1: i32) -> (i32, i32, i32) {
    %c0_i32 = arith.constant 0 : i32
    %c0_i32_0 = arith.constant 0 : i32
    return %arg0, %arg1, %c0_i32 : i32, i32, i32
  }
  func.func @transform_2(%arg0: i32, %arg1: i32) -> (i32, i32) {
    %c0_i32 = arith.constant 0 : i32
    %c0_i32_0 = arith.constant 0 : i32
    return %arg0, %c0_i32 : i32, i32
  }
}

</mosaic_0001>

<bundles_post_ra>
// kernel: tpu_custom_call.1
= control target key start
LH: loop header
LB: loop body
LE: loop exit
PB: predicated region body
PF: predicated region fallthrough
CT: control target
= control target key end

     0   :  { %vm61_vm0 = vcmask 7168   ;;  %v142_v2 = vmov 0   ;;  %vm18_vm1 = vcmask 1024   ;;  %v143_v7 = vmov 0.0   ;;  %s191_s0 = inlined_call_operand.vmem [shape: f32[2,8,32], index: 0, kind: input, shape index: {}]   ;;  %s192_s1 = inlined_call_operand.vmem [shape: f32[2,8,1], index: 1, kind: input, shape index: {}]   ;;  %s193_s2 = inlined_call_operand.hbm [shape: f32[2,32], index: 2, kind: output, shape index: {}]  }
   0x1   :  { %v22_v0 = vld [vmem:[%s192_s1] sm:$0xff]  ;;  %v23_v1 = vld [vmem:[%s192_s1 + $0x8] sm:$0xff]  ;;  %114 = vset.pattern.permute.xlu0 %v142_v2  ;;  %115 = vset.pattern.permute.xlu1 %v142_v2  ;;  %19 = vst.msk [vmem:[#allocation2] sm:$0x3] %vm18_vm1, %v143_v7 }
   0x2   :  { %v62_v3 = vsel %vm61_vm0, %v22_v0, 0.0  ;;  %v69_v4 = vsel %vm61_vm0, %v23_v1, 0.0  ;;  %26 = vperm.xlu0 %114, %v22_v0  }
   0x3   :  { %v63_v5 = vrot.slane %v62_v3, 4  ;;  %v70_v6 = vrot.slane %v69_v4, 4 }
   0x4   :  { %7 = vsyncpa [#allocation4], 0  ;;  %vm54_vm2 = vcmask 1041409   ;;  %vm16_vm3 = vcmask 254976   ;;  %v20_v23 = vld [vmem:[%s191_s0] sm:$0xff]  ;;  %vm37_vm4 = vcmask 261120  }
   0x5   :  { %v64_v8 = vadd.f32 %v63_v5, %v62_v3  ;;  %v71_v9 = vadd.f32 %v70_v6, %v69_v4  ;;  %17 = vst.msk [vmem:[#allocation3] sm:$0x3] %vm16_vm3, %v143_v7  ;;  %v21_v26 = vld [vmem:[%s191_s0 + $0x8] sm:$0xff]  ;;  %s144_s0 = smov [#allocation3]  }
   0x6   :  { %31 = vperm.xlu0 %114, %v23_v1   ;;  %s103_s16 = sshll.u32 %s144_s0, 4  ;;  %s104_s16 = int_to_ptr.vmem [resolvable:$true] %s103_s16 }
   0x7   :  { %v65_v10 = vrot.slane %v64_v8, 2  ;;  %v72_v11 = vrot.slane %v71_v9, 2  ;;  %s118_s17 = scalar_lea.vmem %s104_s16, 32  ;;  %p123_p1 = scmp.lt.s32.totalorder %s104_s16, %s104_s16 }
   0x8   :  { %v60_v18 = vld [vmem:[#allocation2] sm:$0x3]  ;;  %p119_p0 = scmp.ne.s32.totalorder %s104_s16, %s118_s17  ;;  %p124_p2 = scmp.lt.s32.totalorder %s118_s17, %s118_s17 }
   0x9   :  { %v66_v12 = vadd.f32 %v65_v10, %v64_v8  ;;  %v73_v13 = vadd.f32 %v72_v11, %v71_v9 }
   0xa   :  { %p125_p3 = por %p124_p2, %p123_p1 }
   0xb   :  { %v67_v14 = vrot.slane %v66_v12, 1  ;;  %v74_v15 = vrot.slane %v73_v13, 1 }
   0xc   :  { %v36_v43 = vld [vmem:[#allocation3] sm:$0x3]  ;;  %p126_p4 = pnand %p125_p3, %p119_p0 }
   0xd   :  { %v68_v16 = vadd.f32 %v67_v14, %v66_v12  ;;  %v75_v17 = vadd.f32 %v74_v15, %v73_v13 }
   0xf   :  { %v78_v19 = vsel %vm54_vm2, %v75_v17, %v68_v16 }
  0x10   :  { %v80_v20 = vadd.f32 %v78_v19, %v60_v18 }
  0x12   :  { %82 = vst.msk [vmem:[#allocation2] sm:$0x3] %vm18_vm1, %v80_v20 }
  0x19   :  { %v86_v21 = vld [vmem:[#allocation2] sm:$0x3] }
  0x1a   :  { %v87_v22 = vmax.f32 %v86_v21, 1e-09 }
  0x1c   :  { %91 = vperm.xlu1 %115, %v87_v22  }
  0x81   :  { %v27_v24 = vpop.permute.xlu0 %26 }
  0x82   :  { %v34_v25 = vmul.f32 %v27_v24, %v20_v23 }
  0x84   :  { %v38_v27 = vsel %vm37_vm4, %v34_v25, 0.0 }
  0x85   :  { %v39_v28 = vrot.slane %v38_v27, 4  ;;  %v32_v29 = vpop.permute.xlu0 %31 }
  0x86   :  { %v35_v30 = vmul.f32 %v32_v29, %v21_v26 }
  0x87   :  { %v40_v31 = vadd.f32 %v39_v28, %v38_v27 }
  0x88   :  { %v45_v32 = vsel %vm37_vm4, %v35_v30, 0.0 }
  0x89   :  { %v41_v33 = vrot.slane %v40_v31, 2  ;;  %v46_v34 = vrot.slane %v45_v32, 4 }
  0x8b   :  { %v42_v35 = vadd.f32 %v41_v33, %v40_v31  ;;  %v47_v36 = vadd.f32 %v46_v34, %v45_v32 }
  0x8d   :  { %v48_v37 = vrot.slane %v47_v36, 2  ;;  %v43_v38 = vrot.slane %v42_v35, 1 }
  0x8f   :  { %v49_v39 = vadd.f32 %v48_v37, %v47_v36  ;;  %v44_v41 = vadd.f32 %v43_v38, %v42_v35 }
  0x91   :  { %v50_v40 = vrot.slane %v49_v39, 1 }
  0x93   :  { %v51_v42 = vadd.f32 %v50_v40, %v49_v39 }
  0x95   :  { %v55_v44 = vsel %vm54_vm2, %v51_v42, %v44_v41 }
  0x96   :  { %v57_v45 = vadd.f32 %v55_v44, %v36_v43 }
  0x98   :  { %59 = vst.msk [vmem:[#allocation3] sm:$0x3] %vm16_vm3, %v57_v45 }
  0x9b   :  { %v92_v46 = vpop.permute.xlu1 %91 }
  0x9c   :  { %116 = vrcp.f32 %v92_v46 }
  0x9f   :  { %v88_v48 = vld [vmem:[#allocation3] sm:$0x3] }
  0xa6   :  { %v117_v47 = vpop.eup %116 }
  0xa7   :  { %v95_v49 = vmul.f32 %v117_v47, %v88_v48 }
  0xa9   :  { %96 = vst.msk [vmem:[#allocation3] sm:$0x3] %vm16_vm3, %v95_v49 }
  0xaa   :  { %129 = shalt.err (!%p126_p4)
}
  0xab   :  { %s130_s20 = scalar_lea.hbm %s193_s2, 32 }
  0xac   :  { %p131_p5 = scmp.ne.s32.totalorder %s193_s2, %s130_s20  ;;  %p134_p6 = scmp.lt.u32.totalorder %s130_s20, %s193_s2 }
  0xae   :  { %p136_p7 = pnand %p134_p6, %p131_p5 }
  0xb0   :  { %139 = shalt.err (!%p136_p7)
}
  0xb1   :  { %106 = dma.vmem_to_hbm [thread:$0]  %s104_s16, 32, %s193_s2, [#allocation4]  }
  0xb2   :  { %140 = dma.done.wait [#allocation4], 32  }
  0xb3   :  { %141 = vsyncadd [#allocation4], 4294967264 }
  0xb4   :  { %110 = vsyncpa [#allocation4], 1 }

</bundles_post_ra>
